<compile_context>
chip_gen: v7x
topology: tpu7x:2x2x1
jax: 0.10.0
libtpu: 0.0.40
codegen_flags: <defaults>
</compile_context>

<pallas_src>
import jax
import jax.numpy as jnp
from jax.experimental import pallas as pl
from jax.experimental.pallas import tpu as pltpu

CONV_NUM = 32
CONV_MERGE_LEN = 3          # CONV_MERGE_LENS[0]
BN_EPS = 1e-5


# --------------------------------------------------------------------------
# Fused (im2col-)conv + folded-BN + ReLU Pallas kernel
# --------------------------------------------------------------------------
def _conv_bn_relu_kernel(a_ref, w_ref, b_ref, o_ref):
    acc = jnp.dot(a_ref[...], w_ref[...], preferred_element_type=jnp.float32)
    o_ref[...] = jnp.maximum(acc + b_ref[...], 0.0).astype(o_ref.dtype)


def _pick_tile(m, cap=1024):
    """Largest multiple-of-8 divisor of m not exceeding cap (else full m)."""
    if m % 8 != 0:
        return m
    best, t = 8, 8
    while t <= min(m, cap):
        if m % t == 0:
            best = t
        t += 8
    return best


def mer_conv_block_forward(x, params):
    """x: (B, 32, H, W) float32 NCHW (PyTorch layout). Returns (B, 32, H+2, W)."""
    B, C, H, W = x.shape
    assert C == CONV_NUM
    # TODO(synk): dropout (p=0.2) treated as inference-mode identity.

    # ---- fold eval-mode BatchNorm into the conv weight / bias ----
    scale = params["bn_gamma"] / jnp.sqrt(params["bn_var"] + BN_EPS)       # (32,)
    shift = params["bn_beta"] - params["bn_mean"] * scale
    K0 = CONV_NUM * CONV_MERGE_LEN                                          # 96
    w2d = params["conv1_w"].reshape(CONV_NUM, K0)                           # (32, 96) (cin,kw)
    w_fold = w2d.T * scale[None, :]                                         # (96, 32)
    b_fold = params["conv1_b"] * scale + shift                              # (32,)

    # ---- im2col for kernel (1,3), padding (1,1): output spatial (H+2, W) ----
    x_nhwc = jnp.transpose(x, (0, 2, 3, 1)).astype(jnp.bfloat16)            # (B,H,W,32)
    xp = jnp.pad(x_nhwc, ((0, 0), (1, 1), (1, 1), (0, 0)))                  # (B,H+2,W+2,32)
    Ho, Wo = H + 2, W
    cols = [xp[:, :, d:d + Wo, :] for d in range(CONV_MERGE_LEN)]
    patches = jnp.stack(cols, axis=-1)                                      # (B,Ho,Wo,32,3)
    M = B * Ho * Wo
    patches = patches.reshape(M, K0)                                        # (M, 96) bf16

    # ---- lane-dense packing: P spatial rows per output row -> N = P*32 ----
    P = 4 if M % 4 == 0 else (2 if M % 2 == 0 else 1)
    Mp, K, N = M // P, P * K0, P * CONV_NUM
    a = patches.reshape(Mp, K)                                              # (Mp, K) bf16
    w_bd = jnp.kron(jnp.eye(P, dtype=jnp.float32), w_fold).astype(jnp.bfloat16)  # (K, N)
    b_pk = jnp.tile(b_fold, P).reshape(1, N).astype(jnp.float32)            # (1, N)

    tm = _pick_tile(Mp)
    out2d = pl.pallas_call(
        _conv_bn_relu_kernel,
        out_shape=jax.ShapeDtypeStruct((Mp, N), jnp.float32),
        grid_spec=pltpu.PrefetchScalarGridSpec(
            num_scalar_prefetch=0,
            grid=(Mp // tm,),
            in_specs=[
                pl.BlockSpec((tm, K), lambda i: (i, 0)),
                pl.BlockSpec((K, N), lambda i: (0, 0)),   # weight resident across grid
                pl.BlockSpec((1, N), lambda i: (0, 0)),
            ],
            out_specs=pl.BlockSpec((tm, N), lambda i: (i, 0)),
        ),
        compiler_params=pltpu.CompilerParams(
            dimension_semantics=("parallel",)),
    )(a, w_bd, b_pk)

    out = out2d.reshape(B, Ho, Wo, CONV_NUM)
    return jnp.transpose(out, (0, 3, 1, 2))                                 # (B, 32, H+2, W)


# --------------------------------------------------------------------------
# Pure-JAX reference (for a loose sanity check of the fused bf16 kernel)
# --------------------------------------------------------------------------
def reference_forward(x, params):
    y = jax.lax.conv_general_dilated(
        x, params["conv1_w"], window_strides=(1, 1),
        padding=((1, 1), (1, 1)),
        dimension_numbers=("NCHW", "OIHW", "NCHW"))
    y = y + params["conv1_b"][None, :, None, None]
    scale = params["bn_gamma"] / jnp.sqrt(params["bn_var"] + BN_EPS)
    shift = params["bn_beta"] - params["bn_mean"] * scale
    y = y * scale[None, :, None, None] + shift[None, :, None, None]
    return jnp.maximum(y, 0.0)


# --------------------------------------------------------------------------
# Deterministic synthetic parameters (shapes from MerConvBlock.__init__)
# --------------------------------------------------------------------------
def init_params(key):
    ks = jax.random.split(key, 6)
    fan_in = CONV_NUM * 1 * CONV_MERGE_LEN
    bound = 1.0 / jnp.sqrt(float(fan_in))
    p = {}
    p["conv1_w"] = jax.random.uniform(
        ks[0], (CONV_NUM, CONV_NUM, 1, CONV_MERGE_LEN), jnp.float32, -bound, bound)
    p["conv1_b"] = jax.random.uniform(ks[1], (CONV_NUM,), jnp.float32, -bound, bound)
    p["bn_gamma"] = 1.0 + 0.1 * jax.random.normal(ks[2], (CONV_NUM,), jnp.float32)
    p["bn_beta"] = 0.1 * jax.random.normal(ks[3], (CONV_NUM,), jnp.float32)
    p["bn_mean"] = 0.1 * jax.random.normal(ks[4], (CONV_NUM,), jnp.float32)
    p["bn_var"] = 1.0 + jnp.abs(0.1 * jax.random.normal(ks[5], (CONV_NUM,), jnp.float32))
    return p


if __name__ == "__main__":
    key = jax.random.PRNGKey(0)
    k_in, k_par = jax.random.split(key)
    B, H, W = 2, 16, 16
    x = jax.random.normal(k_in, (B, CONV_NUM, H, W), jnp.float32)   # NCHW like PyTorch
    params = init_params(k_par)

    fwd = jax.jit(mer_conv_block_forward)
    out = jax.block_until_ready(fwd(x, params))
    assert out.shape == (B, CONV_NUM, H + 2, W), out.shape
    assert bool(jnp.all(jnp.isfinite(out)))

    ref = reference_forward(x, params)
    max_err = float(jnp.max(jnp.abs(out - ref)))
    assert max_err < 5e-2, max_err
    print("KERNEL_OK")
</pallas_src>

<mosaic_0001>
module attributes {stable_mosaic.version = 11 : i64} {
  func.func @_conv_bn_relu_kernel(%arg0: i32, %arg1: memref<144x384xbf16, #tpu.memory_space<vmem>>, %arg2: memref<384x128xbf16, #tpu.memory_space<vmem>>, %arg3: memref<1x128xf32, #tpu.memory_space<vmem>>, %arg4: memref<144x128xf32, #tpu.memory_space<vmem>>) attributes {dimension_semantics = [#tpu.dimension_semantics<parallel>], iteration_bounds = array<i64: 1>, scalar_prefetch = 0 : i64, scratch_operands = 0 : i64, tpu.core_type = #tpu.core_type<tc>, window_params = [{transform_indices = @transform_0, window_bounds = array<i64: 144, 384>}, {pipeline_mode = #tpu.pipeline_mode<synchronous>, transform_indices = @transform_1, window_bounds = array<i64: 384, 128>}, {pipeline_mode = #tpu.pipeline_mode<synchronous>, transform_indices = @transform_2, window_bounds = array<i64: 1, 128>}, {transform_indices = @transform_3, window_bounds = array<i64: 144, 128>}]} {
    %c0 = arith.constant 0 : index
    %c0_0 = arith.constant 0 : index
    %0 = vector.load %arg1[%c0, %c0_0] : memref<144x384xbf16, #tpu.memory_space<vmem>>, vector<144x384xbf16>
    %c0_1 = arith.constant 0 : index
    %c0_2 = arith.constant 0 : index
    %1 = vector.load %arg2[%c0_1, %c0_2] : memref<384x128xbf16, #tpu.memory_space<vmem>>, vector<384x128xbf16>
    %cst = arith.constant dense<0.000000e+00> : vector<144x128xf32>
    %2 = tpu.matmul %0, %1, %cst {dimension_numbers = #tpu.dot_dimension_numbers<[1], [0], [0], [1], [0, 0, 1, 1], [], []>} : vector<144x384xbf16>, vector<384x128xbf16>, vector<144x128xf32> -> vector<144x128xf32>
    %c0_3 = arith.constant 0 : index
    %c0_4 = arith.constant 0 : index
    %3 = vector.load %arg3[%c0_3, %c0_4] : memref<1x128xf32, #tpu.memory_space<vmem>>, vector<1x128xf32>
    %4 = vector.broadcast %3 : vector<1x128xf32> to vector<144x128xf32>
    %5 = arith.addf %2, %4 : vector<144x128xf32>
    %cst_5 = arith.constant 0.000000e+00 : f32
    %6 = vector.broadcast %cst_5 : f32 to vector<144x128xf32>
    %7 = arith.maximumf %5, %6 : vector<144x128xf32>
    %c0_6 = arith.constant 0 : index
    %c0_7 = arith.constant 0 : index
    %8 = vector.load %arg4[%c0_6, %c0_7] : memref<144x128xf32, #tpu.memory_space<vmem>>, vector<144x128xf32>
    tpu.vector_store %arg4[%c0_6, %c0_7], %7 {strides = array<i32>} : memref<144x128xf32, #tpu.memory_space<vmem>>, vector<144x128xf32>,
    return
  }
  func.func @transform_0(%arg0: i32) -> (i32, i32) {
    %c0_i32 = arith.constant 0 : i32
    %c0_i32_0 = arith.constant 0 : i32
    return %arg0, %c0_i32 : i32, i32
  }
  func.func @transform_1(%arg0: i32) -> (i32, i32) {
    %c0_i32 = arith.constant 0 : i32
    %c0_i32_0 = arith.constant 0 : i32
    %c0_i32_1 = arith.constant 0 : i32
    return %c0_i32, %c0_i32_0 : i32, i32
  }
  func.func @transform_2(%arg0: i32) -> (i32, i32) {
    %c0_i32 = arith.constant 0 : i32
    %c0_i32_0 = arith.constant 0 : i32
    %c0_i32_1 = arith.constant 0 : i32
    return %c0_i32, %c0_i32_0 : i32, i32
  }
  func.func @transform_3(%arg0: i32) -> (i32, i32) {
    %c0_i32 = arith.constant 0 : i32
    %c0_i32_0 = arith.constant 0 : i32
    return %arg0, %c0_i32 : i32, i32
  }
}

</mosaic_0001>

<bundles_post_ra>
// kernel: tile.8
= control target key start
LH: loop header
LB: loop body
LE: loop exit
PB: predicated region body
PF: predicated region fallthrough
CT: control target
= control target key end

     0   :  { %s22_s0 = inlined_call_operand.vmem [shape: f32[32], index: 0, kind: input, shape index: {}]   ;;  %s23_s1 = inlined_call_operand.vmem [shape: f32[4,32], index: 1, kind: output, shape index: {}]  }
   0x1   :  { %v4_v0 = vld [vmem:[%s22_s0] ss:$0 sm:$0xff] }
   0x2   :  { %5 = vst [vmem:[%s23_s1] sm:$0xf] %v4_v0 }

// kernel: tile.9
= control target key start
LH: loop header
LB: loop body
LE: loop exit
PB: predicated region body
PF: predicated region fallthrough
CT: control target
= control target key end

     0   :  { %vm7_vm0 = vcmask 261120   ;;  %s37_s8 = smov 32   ;;  %s38_s9 = smov 64   ;;  %vm13_vm1 = vcmask 1048320   ;;  %vm19_vm2 = vcmask 785920   ;;  %vm25_vm3 = vcmask 523520   ;;  %s55_s0 = inlined_call_operand.vmem [shape: f32[4,32], index: 0, kind: input, shape index: {}]   ;;  %s56_s1 = inlined_call_operand.vmem [shape: f32[1,128], index: 1, kind: output, shape index: {}]  }
   0x1   :  { %v4_v0 = vld [vmem:[%s55_s0] sm:$0xf]  ;;  %s36_s0 = smov 96  }
   0x2   :  { %5 = vst [vmem:[#allocation1] sm:$0xf] %v4_v0 }
   0x9   :  { %v10_v1 = vld [vmem:[#allocation1 + $0x3] sm:$0x1]   ;;  %v22_v2 = vld [vmem:[#allocation1 + $0x1] sm:$0x1]   ;;  %v6_v3 = vld [vmem:[#allocation1] sm:$0x1]  }
   0xa   :  { %11 = vrot.lane.b32.xlu0 %v10_v1, %s36_s0  ;;  %23 = vrot.lane.b32.xlu1 %v22_v2, %s37_s8  ;;  %v16_v4 = vld [vmem:[#allocation1 + $0x2] sm:$0x1]   ;;  %8 = vst.msk [vmem:[#allocation0] sm:$0x1] %vm7_vm0, %v6_v3  }
   0xe   :  { %17 = vrot.lane.b32.xlu0 %v16_v4, %s38_s9 }
  0x7c   :  { %v12_v5 = vpop.permute.xlu0 %11   ;;  %v24_v6 = vpop.permute.xlu1 %23  }
  0x7d   :  { %14 = vst.msk [vmem:[#allocation0] sm:$0x1] %vm13_vm1, %v12_v5  }
  0x80   :  { %v18_v7 = vpop.permute.xlu0 %17  }
  0x81   :  { %20 = vst.msk [vmem:[#allocation0] sm:$0x1] %vm19_vm2, %v18_v7  }
  0x82   :  { %26 = vst.msk [vmem:[#allocation0] sm:$0x1] %vm25_vm3, %v24_v6  }
  0x89   :  { %v30_v8 = vld [vmem:[#allocation0] sm:$0x1] }
  0x8a   :  { %32 = vst [vmem:[%s56_s1] sm:$0x1] %v30_v8 }

// kernel: mer_conv_block_forward.1
= control target key start
LH: loop header
LB: loop body
LE: loop exit
PB: predicated region body
PF: predicated region fallthrough
CT: control target
= control target key end

     0   :  { %v897_v1 = vmov 0.0   ;;  %vm898_vm0 = vmmov 0   ;;  %s1175_s1 = inlined_call_operand.vmem [shape: bf16[384,128], index: 1, kind: input, shape index: {}]   ;;  %s1176_s0 = inlined_call_operand.vmem [shape: bf16[144,384], index: 0, kind: input, shape index: {}]   ;;  %s1177_s2 = inlined_call_operand.vmem [shape: f32[1,128], index: 2, kind: input, shape index: {}]   ;;  %s1178_s3 = inlined_call_operand.vmem [shape: f32[144,128], index: 3, kind: output, shape index: {}]  }
   0x1   :  { %v837_v0 = vld [vmem:[%s1175_s1 + $0x40] sm:$0xff]   ;;  %783 = vmatprep.subr.bf16.mxu1 %v897_v1  ;;  %799 = vmatprep.mubr.msk.bf16.mxu1 %vm898_vm0, %v897_v1  ;;  %v840_v4 = vld [vmem:[%s1175_s1 + $0x48] sm:$0xff]   ;;  %v843_v7 = vld [vmem:[%s1175_s1 + $0x50] sm:$0xff]  }
   0x2   :  { %v838_v2 = vld [vmem:[%s1175_s1] sm:$0xff]   ;;  %696 = vmatprep.subr.bf16.mxu0 %v837_v0  ;;  %v841_v5 = vld [vmem:[%s1175_s1 + $0x8] sm:$0xff]   ;;  %v844_v8 = vld [vmem:[%s1175_s1 + $0x10] sm:$0xff]  }
   0x3   :  { %v839_v3 = vld [vmem:[%s1175_s1 + $0x80] sm:$0xff]   ;;  %697 = vmatpush3.bf16.msra.mxu0 %v838_v2  ;;  %v842_v6 = vld [vmem:[%s1175_s1 + $0x88] sm:$0xff]   ;;  %v845_v9 = vld [vmem:[%s1175_s1 + $0x90] sm:$0xff]  }
   0x4   :  { %784 = vmatpush3.bf16.msra.mxu1 %v839_v3  ;;  %698 = vmatprep.subr.bf16.mxu0 %v840_v4  ;;  %v846_v10 = vld [vmem:[%s1175_s1 + $0x58] sm:$0xff]   ;;  %v849_v13 = vld [vmem:[%s1175_s1 + $0x60] sm:$0xff]   ;;  %v852_v16 = vld [vmem:[%s1175_s1 + $0x68] sm:$0xff]  }
   0x5   :  { %785 = vmatprep.subr.bf16.mxu1 %v897_v1  ;;  %v847_v11 = vld [vmem:[%s1175_s1 + $0x18] sm:$0xff]   ;;  %v850_v14 = vld [vmem:[%s1175_s1 + $0x20] sm:$0xff]   ;;  %v853_v17 = vld [vmem:[%s1175_s1 + $0x28] sm:$0xff]  }
   0x6   :  { %v848_v12 = vld [vmem:[%s1175_s1 + $0x98] sm:$0xff]   ;;  %v851_v15 = vld [vmem:[%s1175_s1 + $0xa0] sm:$0xff]   ;;  %v854_v18 = vld [vmem:[%s1175_s1 + $0xa8] sm:$0xff]  }
   0x7   :  { %699 = vmatpush3.bf16.msra.mxu0 %v841_v5  ;;  %v855_v19 = vld [vmem:[%s1175_s1 + $0x70] sm:$0xff]   ;;  %v858_v22 = vld [vmem:[%s1175_s1 + $0x78] sm:$0xff]   ;;  %v860_v26 = vld [vmem:[%s1176_s0] ss:$12 sps:$4 sm:$0xff]  }
   0x8   :  { %786 = vmatpush3.bf16.msra.mxu1 %v842_v6  ;;  %700 = vmatprep.subr.bf16.mxu0 %v843_v7  ;;  %v856_v20 = vld [vmem:[%s1175_s1 + $0x30] sm:$0xff]   ;;  %v859_v24 = vld [vmem:[%s1175_s1 + $0x38] sm:$0xff]   ;;  %v868_v30 = vld [vmem:[%s1176_s0 + $0x20] ss:$12 sps:$4 sm:$0xff]  }
   0x9   :  { %787 = vmatprep.subr.bf16.mxu1 %v897_v1  ;;  %v857_v21 = vld [vmem:[%s1175_s1 + $0xb0] sm:$0xff]   ;;  %v863_v25 = vld [vmem:[%s1175_s1 + $0xb8] sm:$0xff]   ;;  %v879_v38 = vld [vmem:[%s1176_s0 + $0x60] ss:$12 sps:$4 sm:$0xff]  }
   0xa   :  { %v862_v23 = vld [vmem:[%s1176_s0 + $0x4] ss:$12 sps:$4 sm:$0xff]   ;;  %v864_v27 = vld [vmem:[%s1176_s0 + $0x8] ss:$12 sps:$4 sm:$0xff]   ;;  %v873_v34 = vld [vmem:[%s1176_s0 + $0x4c] ss:$12 sps:$4 sm:$0xff]  }
   0xb   :  { %701 = vmatpush3.bf16.msra.mxu0 %v844_v8  ;;  %426 = vmatprep.mubr.bf16.mxu0 %v862_v23  ;;  %v865_v28 = vld [vmem:[%s1176_s0 + $0x1c] ss:$12 sps:$4 sm:$0xff]   ;;  %v867_v29 = vld [vmem:[%s1176_s0 + $0x18] ss:$12 sps:$4 sm:$0xff]   ;;  %v869_v31 = vld [vmem:[%s1176_s0 + $0x34] ss:$12 sps:$4 sm:$0xff]  }
   0xc   :  { %788 = vmatpush3.bf16.msra.mxu1 %v845_v9  ;;  %702 = vmatprep.subr.bf16.mxu0 %v846_v10  ;;  %v871_v32 = vld [vmem:[%s1176_s0 + $0x30] ss:$12 sps:$4 sm:$0xff]   ;;  %v872_v33 = vld [vmem:[%s1176_s0 + $0x38] ss:$12 sps:$4 sm:$0xff]   ;;  %v875_v35 = vld [vmem:[%s1176_s0 + $0x48] ss:$12 sps:$4 sm:$0xff]  }
   0xd   :  { %789 = vmatprep.subr.bf16.mxu1 %v897_v1  ;;  %v876_v36 = vld [vmem:[%s1176_s0 + $0x50] ss:$12 sps:$4 sm:$0xff]   ;;  %v880_v39 = vld [vmem:[%s1176_s0 + $0x68] ss:$12 sps:$4 sm:$0xff]   ;;  %v883_v41 = vld [vmem:[%s1176_s0 + $0x78] ss:$12 sps:$4 sm:$0xff]  }
   0xe   :  { %v877_v37 = vld [vmem:[%s1176_s0 + $0x64] ss:$12 sps:$4 sm:$0xff]   ;;  %v881_v40 = vld [vmem:[%s1176_s0 + $0x7c] ss:$12 sps:$4 sm:$0xff]   ;;  %v884_v42 = vld [vmem:[%s1176_s0 + $0x80] ss:$12 sps:$4 sm:$0xff]  }
   0xf   :  { %703 = vmatpush3.bf16.msra.mxu0 %v847_v11  ;;  %v885_v43 = vld [vmem:[%s1176_s0 + $0x94] ss:$12 sps:$4 sm:$0xff]   ;;  %v887_v44 = vld [vmem:[%s1176_s0 + $0x90] ss:$12 sps:$4 sm:$0xff]   ;;  %v888_v45 = vld [vmem:[%s1176_s0 + $0x98] ss:$12 sps:$4 sm:$0xff]  }
  0x10   :  { %790 = vmatpush3.bf16.msra.mxu1 %v848_v12  ;;  %704 = vmatprep.subr.bf16.mxu0 %v849_v13  ;;  %v889_v46 = vld [vmem:[%s1176_s0 + $0xac] ss:$12 sps:$4 sm:$0xff]   ;;  %v891_v47 = vld [vmem:[%s1176_s0 + $0xa8] ss:$12 sps:$4 sm:$0xff]   ;;  %v892_v48 = vld [vmem:[%s1176_s0 + $0xb0] ss:$12 sps:$4 sm:$0xff]  }
  0x11   :  { %791 = vmatprep.subr.bf16.mxu1 %v897_v1  ;;  %v893_v49 = vld [vmem:[%s1176_s0 + $0xc4] ss:$12 sps:$4 sm:$0xff]   ;;  %v895_v50 = vld [vmem:[%s1176_s0 + $0xc0] ss:$12 sps:$4 sm:$0xff]   ;;  %v896_v51 = vld [vmem:[%s1176_s0 + $0xc8] ss:$12 sps:$4 sm:$0xff]  }
  0x12   :  { %v1101_v54 = vld [vmem:[%s1177_s2] ss:$0 sm:$0xff] }
  0x13   :  { %705 = vmatpush3.bf16.msra.mxu0 %v850_v14 }
  0x14   :  { %792 = vmatpush3.bf16.msra.mxu1 %v851_v15  ;;  %706 = vmatprep.subr.bf16.mxu0 %v852_v16 }
  0x15   :  { %793 = vmatprep.subr.bf16.mxu1 %v897_v1 }
  0x17   :  { %707 = vmatpush3.bf16.msra.mxu0 %v853_v17 }
  0x18   :  { %794 = vmatpush3.bf16.msra.mxu1 %v854_v18  ;;  %708 = vmatprep.subr.bf16.mxu0 %v855_v19 }
  0x19   :  { %795 = vmatprep.subr.bf16.mxu1 %v897_v1 }
  0x1b   :  { %709 = vmatpush3.bf16.msra.mxu0 %v856_v20 }
  0x1c   :  { %796 = vmatpush3.bf16.msra.mxu1 %v857_v21  ;;  %710 = vmatprep.subr.bf16.mxu0 %v858_v22 }
  0x1d   :  { %797 = vmatprep.subr.bf16.mxu1 %v897_v1 }
  0x1f   :  { %711 = vmatpush3.bf16.msra.mxu0 %v859_v24 }
  0x20   :  { %798 = vmatpush3.bf16.msra.mxu1 %v863_v25 }
  0x22   :  { %427 = vmatmul.mubr.bf16.vlgmr.msra.gmra.mrb[0].mxu0 %v860_v26 }
  0x23   :  { %800 = vmatmul.mubr.bf16.vlgmr.msra.gmra.mrb[0].mxu1 %v864_v27  ;;  %434 = vmatprep.mubr.bf16.mxu0 %v865_v28 }
  0x24   :  { %803 = vmatprep.mubr.msk.bf16.mxu1 %vm898_vm0, %v897_v1 }
  0x2a   :  { %435 = vmatmul.mubr.bf16.gmra.mrb[4].mxu0 %v867_v29 }
  0x2b   :  { %804 = vmatmul.mubr.bf16.gmra.mrb[4].mxu1 %v868_v30  ;;  %442 = vmatprep.mubr.bf16.mxu0 %v869_v31 }
  0x2c   :  { %807 = vmatprep.mubr.msk.bf16.mxu1 %vm898_vm0, %v897_v1 }
  0x32   :  { %443 = vmatmul.mubr.bf16.gmra.mrb[8].mxu0 %v871_v32 }
  0x33   :  { %808 = vmatmul.mubr.bf16.gmra.mrb[8].mxu1 %v872_v33  ;;  %450 = vmatprep.mubr.bf16.mxu0 %v873_v34 }
  0x34   :  { %811 = vmatprep.mubr.msk.bf16.mxu1 %vm898_vm0, %v897_v1 }
  0x3a   :  { %451 = vmatmul.mubr.bf16.gmra.mrb[12].mxu0 %v875_v35 }
  0x3b   :  { %812 = vmatmul.mubr.bf16.gmra.mrb[12].mxu1 %v876_v36  ;;  %458 = vmatprep.mubr.bf16.mxu0 %v877_v37 }
  0x3c   :  { %815 = vmatprep.mubr.msk.bf16.mxu1 %vm898_vm0, %v897_v1 }
  0x42   :  { %459 = vmatmul.mubr.bf16.gmra.mrb[16].mxu0 %v879_v38 }
  0x43   :  { %816 = vmatmul.mubr.bf16.gmra.mrb[16].mxu1 %v880_v39  ;;  %466 = vmatprep.mubr.bf16.mxu0 %v881_v40 }
  0x44   :  { %819 = vmatprep.mubr.msk.bf16.mxu1 %vm898_vm0, %v897_v1 }
  0x4a   :  { %467 = vmatmul.mubr.bf16.gmra.mrb[20].mxu0 %v883_v41 }
  0x4b   :  { %820 = vmatmul.mubr.bf16.gmra.mrb[20].mxu1 %v884_v42  ;;  %474 = vmatprep.mubr.bf16.mxu0 %v885_v43 }
  0x4c   :  { %823 = vmatprep.mubr.msk.bf16.mxu1 %vm898_vm0, %v897_v1 }
  0x52   :  { %475 = vmatmul.mubr.bf16.gmra.mrb[24].mxu0 %v887_v44 }
  0x53   :  { %824 = vmatmul.mubr.bf16.gmra.mrb[24].mxu1 %v888_v45  ;;  %482 = vmatprep.mubr.bf16.mxu0 %v889_v46 }
  0x54   :  { %827 = vmatprep.mubr.msk.bf16.mxu1 %vm898_vm0, %v897_v1 }
  0x5a   :  { %483 = vmatmul.mubr.bf16.gmra.mrb[28].mxu0 %v891_v47 }
  0x5b   :  { %828 = vmatmul.mubr.bf16.gmra.mrb[28].mxu1 %v892_v48  ;;  %490 = vmatprep.mubr.bf16.mxu0 %v893_v49 }
  0x5c   :  { %831 = vmatprep.mubr.msk.bf16.mxu1 %vm898_vm0, %v897_v1 }
  0x62   :  { %491 = vmatmul.mubr.bf16.gmra.mrb[32].mxu0 %v895_v50 }
  0x63   :  { %832 = vmatmul.mubr.bf16.gmra.mrb[32].mxu1 %v896_v51 }
  0xf5   :  { %v712_v52 = vpop.f32.mrb[0].mxu0 }
  0xf6   :  { %v713_v53 = vpop.f32.mrb[1].mxu0  ;;  %v533_v55 = vpop.f32.mrb[0].mxu1 }
  0xf7   :  { %v714_v56 = vadd.f32 %v713_v53, %v712_v52  ;;  %v715_v57 = vpop.f32.mrb[2].mxu0  ;;  %v801_v58 = vpop.f32.mrb[1].mxu1 }
  0xf8   :  { %v716_v59 = vpop.f32.mrb[3].mxu0  ;;  %v536_v60 = vpop.f32.mrb[2].mxu1 }
  0xf9   :  { %v429_v61 = vadd.f32 %v714_v56, %v1101_v54  ;;  %v717_v62 = vadd.f32 %v716_v59, %v715_v57  ;;  %v802_v63 = vpop.f32.mrb[3].mxu1 }
  0xfb   :  { %v534_v0 = vadd.f32 %v533_v55, %v429_v61  ;;  %v432_v1 = vadd.f32 %v717_v62, %v1101_v54 }
  0xfd   :  { %v604_v2 = vmax.f32 %v534_v0, 0.0  ;;  %v537_v3 = vadd.f32 %v536_v60, %v432_v1  ;;  %v718_v4 = vpop.f32.mrb[4].mxu0 }
  0xfe   :  { %v719_v5 = vpop.f32.mrb[5].mxu0  ;;  %v541_v6 = vpop.f32.mrb[4].mxu1 }
  0xff   :  { %622 = vst [vmem:[%s1178_s3] sm:$0xff] %v604_v2  ;;  %v605_v7 = vmax.f32 %v537_v3, 0.0  ;;  %v720_v8 = vadd.f32 %v719_v5, %v718_v4  ;;  %v721_v9 = vpop.f32.mrb[6].mxu0  ;;  %v805_v10 = vpop.f32.mrb[5].mxu1 }
 0x100   :  { %v722_v11 = vpop.f32.mrb[7].mxu0  ;;  %v544_v12 = vpop.f32.mrb[6].mxu1 }
 0x101   :  { %623 = vst [vmem:[%s1178_s3 + $0x8] sm:$0xff] %v605_v7  ;;  %v437_v13 = vadd.f32 %v720_v8, %v1101_v54  ;;  %v723_v14 = vadd.f32 %v722_v11, %v721_v9  ;;  %v806_v15 = vpop.f32.mrb[7].mxu1 }
 0x103   :  { %v542_v16 = vadd.f32 %v541_v6, %v437_v13  ;;  %v440_v17 = vadd.f32 %v723_v14, %v1101_v54 }
 0x105   :  { %v606_v18 = vmax.f32 %v542_v16, 0.0  ;;  %v545_v19 = vadd.f32 %v544_v12, %v440_v17  ;;  %v724_v20 = vpop.f32.mrb[8].mxu0 }
 0x106   :  { %v725_v21 = vpop.f32.mrb[9].mxu0  ;;  %v549_v22 = vpop.f32.mrb[8].mxu1 }
 0x107   :  { %624 = vst [vmem:[%s1178_s3 + $0x10] sm:$0xff] %v606_v18  ;;  %v607_v23 = vmax.f32 %v545_v19, 0.0  ;;  %v726_v24 = vadd.f32 %v725_v21, %v724_v20  ;;  %v727_v25 = vpop.f32.mrb[10].mxu0  ;;  %v809_v26 = vpop.f32.mrb[9].mxu1 }
 0x108   :  { %v728_v27 = vpop.f32.mrb[11].mxu0  ;;  %v552_v28 = vpop.f32.mrb[10].mxu1 }
 0x109   :  { %625 = vst [vmem:[%s1178_s3 + $0x18] sm:$0xff] %v607_v23  ;;  %v445_v29 = vadd.f32 %v726_v24, %v1101_v54  ;;  %v729_v30 = vadd.f32 %v728_v27, %v727_v25  ;;  %v810_v31 = vpop.f32.mrb[11].mxu1 }
 0x10b   :  { %v550_v32 = vadd.f32 %v549_v22, %v445_v29  ;;  %v448_v33 = vadd.f32 %v729_v30, %v1101_v54 }
 0x10d   :  { %v608_v34 = vmax.f32 %v550_v32, 0.0  ;;  %v553_v35 = vadd.f32 %v552_v28, %v448_v33  ;;  %v730_v36 = vpop.f32.mrb[12].mxu0 }
 0x10e   :  { %v731_v37 = vpop.f32.mrb[13].mxu0  ;;  %v557_v38 = vpop.f32.mrb[12].mxu1 }
 0x10f   :  { %626 = vst [vmem:[%s1178_s3 + $0x20] sm:$0xff] %v608_v34  ;;  %v609_v39 = vmax.f32 %v553_v35, 0.0  ;;  %v732_v40 = vadd.f32 %v731_v37, %v730_v36  ;;  %v733_v41 = vpop.f32.mrb[14].mxu0  ;;  %v813_v42 = vpop.f32.mrb[13].mxu1 }
 0x110   :  { %v734_v43 = vpop.f32.mrb[15].mxu0  ;;  %v560_v44 = vpop.f32.mrb[14].mxu1 }
 0x111   :  { %627 = vst [vmem:[%s1178_s3 + $0x28] sm:$0xff] %v609_v39  ;;  %v453_v45 = vadd.f32 %v732_v40, %v1101_v54  ;;  %v735_v46 = vadd.f32 %v734_v43, %v733_v41  ;;  %v814_v47 = vpop.f32.mrb[15].mxu1 }
 0x113   :  { %v558_v48 = vadd.f32 %v557_v38, %v453_v45  ;;  %v456_v49 = vadd.f32 %v735_v46, %v1101_v54 }
 0x115   :  { %v610_v50 = vmax.f32 %v558_v48, 0.0  ;;  %v561_v51 = vadd.f32 %v560_v44, %v456_v49  ;;  %v736_v52 = vpop.f32.mrb[16].mxu0 }
 0x116   :  { %v737_v53 = vpop.f32.mrb[17].mxu0  ;;  %v565_v55 = vpop.f32.mrb[16].mxu1 }
 0x117   :  { %628 = vst [vmem:[%s1178_s3 + $0x30] sm:$0xff] %v610_v50  ;;  %v611_v56 = vmax.f32 %v561_v51, 0.0  ;;  %v738_v57 = vadd.f32 %v737_v53, %v736_v52  ;;  %v739_v58 = vpop.f32.mrb[18].mxu0  ;;  %v817_v59 = vpop.f32.mrb[17].mxu1 }
 0x118   :  { %v740_v60 = vpop.f32.mrb[19].mxu0  ;;  %v568_v61 = vpop.f32.mrb[18].mxu1 }
 0x119   :  { %629 = vst [vmem:[%s1178_s3 + $0x38] sm:$0xff] %v611_v56  ;;  %v461_v62 = vadd.f32 %v738_v57, %v1101_v54  ;;  %v741_v63 = vadd.f32 %v740_v60, %v739_v58  ;;  %v818_v0 = vpop.f32.mrb[19].mxu1 }
 0x11b   :  { %v566_v1 = vadd.f32 %v565_v55, %v461_v62  ;;  %v464_v2 = vadd.f32 %v741_v63, %v1101_v54 }
 0x11d   :  { %v612_v3 = vmax.f32 %v566_v1, 0.0  ;;  %v569_v4 = vadd.f32 %v568_v61, %v464_v2  ;;  %v742_v5 = vpop.f32.mrb[20].mxu0 }
 0x11e   :  { %v743_v6 = vpop.f32.mrb[21].mxu0  ;;  %v573_v7 = vpop.f32.mrb[20].mxu1 }
 0x11f   :  { %630 = vst [vmem:[%s1178_s3 + $0x40] sm:$0xff] %v612_v3  ;;  %v613_v8 = vmax.f32 %v569_v4, 0.0  ;;  %v744_v9 = vadd.f32 %v743_v6, %v742_v5  ;;  %v745_v10 = vpop.f32.mrb[22].mxu0  ;;  %v821_v11 = vpop.f32.mrb[21].mxu1 }
 0x120   :  { %v746_v12 = vpop.f32.mrb[23].mxu0  ;;  %v576_v13 = vpop.f32.mrb[22].mxu1 }
 0x121   :  { %631 = vst [vmem:[%s1178_s3 + $0x48] sm:$0xff] %v613_v8  ;;  %v469_v14 = vadd.f32 %v744_v9, %v1101_v54  ;;  %v747_v15 = vadd.f32 %v746_v12, %v745_v10  ;;  %v822_v16 = vpop.f32.mrb[23].mxu1 }
 0x123   :  { %v574_v17 = vadd.f32 %v573_v7, %v469_v14  ;;  %v472_v18 = vadd.f32 %v747_v15, %v1101_v54 }
 0x125   :  { %v614_v19 = vmax.f32 %v574_v17, 0.0  ;;  %v577_v20 = vadd.f32 %v576_v13, %v472_v18  ;;  %v748_v21 = vpop.f32.mrb[24].mxu0 }
 0x126   :  { %v749_v22 = vpop.f32.mrb[25].mxu0  ;;  %v581_v23 = vpop.f32.mrb[24].mxu1 }
 0x127   :  { %632 = vst [vmem:[%s1178_s3 + $0x50] sm:$0xff] %v614_v19  ;;  %v615_v24 = vmax.f32 %v577_v20, 0.0  ;;  %v750_v25 = vadd.f32 %v749_v22, %v748_v21  ;;  %v751_v26 = vpop.f32.mrb[26].mxu0  ;;  %v825_v27 = vpop.f32.mrb[25].mxu1 }
 0x128   :  { %v752_v28 = vpop.f32.mrb[27].mxu0  ;;  %v584_v29 = vpop.f32.mrb[26].mxu1 }
 0x129   :  { %633 = vst [vmem:[%s1178_s3 + $0x58] sm:$0xff] %v615_v24  ;;  %v477_v30 = vadd.f32 %v750_v25, %v1101_v54  ;;  %v753_v31 = vadd.f32 %v752_v28, %v751_v26  ;;  %v826_v32 = vpop.f32.mrb[27].mxu1 }
 0x12b   :  { %v582_v33 = vadd.f32 %v581_v23, %v477_v30  ;;  %v480_v34 = vadd.f32 %v753_v31, %v1101_v54 }
 0x12d   :  { %v616_v35 = vmax.f32 %v582_v33, 0.0  ;;  %v585_v36 = vadd.f32 %v584_v29, %v480_v34  ;;  %v754_v37 = vpop.f32.mrb[28].mxu0 }
 0x12e   :  { %v755_v38 = vpop.f32.mrb[29].mxu0  ;;  %v589_v39 = vpop.f32.mrb[28].mxu1 }
 0x12f   :  { %634 = vst [vmem:[%s1178_s3 + $0x60] sm:$0xff] %v616_v35  ;;  %v617_v40 = vmax.f32 %v585_v36, 0.0  ;;  %v756_v41 = vadd.f32 %v755_v38, %v754_v37  ;;  %v757_v42 = vpop.f32.mrb[30].mxu0  ;;  %v829_v43 = vpop.f32.mrb[29].mxu1 }
 0x130   :  { %v758_v44 = vpop.f32.mrb[31].mxu0  ;;  %v592_v45 = vpop.f32.mrb[30].mxu1 }
 0x131   :  { %635 = vst [vmem:[%s1178_s3 + $0x68] sm:$0xff] %v617_v40  ;;  %v485_v46 = vadd.f32 %v756_v41, %v1101_v54  ;;  %v759_v47 = vadd.f32 %v758_v44, %v757_v42  ;;  %v830_v48 = vpop.f32.mrb[31].mxu1 }
 0x133   :  { %v590_v49 = vadd.f32 %v589_v39, %v485_v46  ;;  %v488_v50 = vadd.f32 %v759_v47, %v1101_v54 }
 0x135   :  { %v618_v51 = vmax.f32 %v590_v49, 0.0  ;;  %v593_v52 = vadd.f32 %v592_v45, %v488_v50  ;;  %v760_v53 = vpop.f32.mrb[32].mxu0 }
 0x136   :  { %v761_v55 = vpop.f32.mrb[33].mxu0  ;;  %v597_v56 = vpop.f32.mrb[32].mxu1 }
 0x137   :  { %636 = vst [vmem:[%s1178_s3 + $0x70] sm:$0xff] %v618_v51  ;;  %v619_v57 = vmax.f32 %v593_v52, 0.0  ;;  %v762_v58 = vadd.f32 %v761_v55, %v760_v53  ;;  %v763_v59 = vpop.f32.mrb[34].mxu0  ;;  %v833_v60 = vpop.f32.mrb[33].mxu1 }
 0x138   :  { %v764_v61 = vpop.f32.mrb[35].mxu0  ;;  %v600_v62 = vpop.f32.mrb[34].mxu1 }
 0x139   :  { %637 = vst [vmem:[%s1178_s3 + $0x78] sm:$0xff] %v619_v57  ;;  %v493_v63 = vadd.f32 %v762_v58, %v1101_v54  ;;  %v765_v0 = vadd.f32 %v764_v61, %v763_v59  ;;  %v834_v1 = vpop.f32.mrb[35].mxu1 }
 0x13b   :  { %v598_v2 = vadd.f32 %v597_v56, %v493_v63  ;;  %v496_v3 = vadd.f32 %v765_v0, %v1101_v54 }
 0x13d   :  { %v620_v4 = vmax.f32 %v598_v2, 0.0  ;;  %v601_v5 = vadd.f32 %v600_v62, %v496_v3 }
 0x13f   :  { %638 = vst [vmem:[%s1178_s3 + $0x80] sm:$0xff] %v620_v4  ;;  %v621_v6 = vmax.f32 %v601_v5, 0.0 }
 0x141   :  { %639 = vst [vmem:[%s1178_s3 + $0x88] sm:$0xff] %v621_v6 }

</bundles_post_ra>
